<compile_context>
chip_gen: v7x
topology: tpu7x:2x2x1
jax: 0.10.0
libtpu: 0.0.40
codegen_flags: <defaults>
</compile_context>

<pallas_src>
import functools

import jax
import jax.numpy as jnp
from jax.experimental import pallas as pl
from jax.experimental.pallas import tpu as pltpu


_MAX_TILE_B = 2048  # batch rows per grid step (multiple of 8 sublanes)


def _round_up(x: int, m: int) -> int:
    return ((x + m - 1) // m) * m


# -----------------------------------------------------------------------------
# Pallas kernel: both Q streams fused into one 128-lane-wide MLP.
# -----------------------------------------------------------------------------
def _matd3_fused_kernel(x_ref,                                  # [TB, in_pad] bf16
                        w1_ref, b1_ref, w2_ref, b2_ref,         # resident weights
                        w3v_ref, b3_ref,                        # resident weights
                        q_ref):                                 # [TB, 2] f32
    # Layer 1: single K=in_pad matmul (bf16 operands, f32 MXU accumulation).
    h1 = jnp.dot(x_ref[...], w1_ref[...], preferred_element_type=jnp.float32)
    h1 = jnp.maximum(h1 + b1_ref[...], 0.0)                     # f32 [TB, 2H]

    # Layer 2: block-diagonal [2H, 2H]; bf16 operands, f32 accumulation,
    # bias/ReLU kept in f32.
    h2 = jnp.dot(h1.astype(jnp.bfloat16), w2_ref[...],
                 preferred_element_type=jnp.float32)
    h2 = jnp.maximum(h2 + b2_ref[...], 0.0)                     # f32 [TB, 2H]

    # Layer 3 (output dim 2): VPU multiply + two masked XLU half-sums instead
    # of an N=2 MXU matmul.  Lanes [0, H) -> q1, lanes [H, 2H) -> q2.
    prod = h2 * w3v_ref[...]                                    # f32 [TB, 2H]
    lane = jax.lax.broadcasted_iota(jnp.int32, prod.shape, 1)
    half = prod.shape[-1] // 2
    q1 = jnp.sum(jnp.where(lane < half, prod, 0.0), axis=-1, keepdims=True)
    q2 = jnp.sum(jnp.where(lane >= half, prod, 0.0), axis=-1, keepdims=True)
    q_ref[...] = jnp.concatenate([q1, q2], axis=-1) + b3_ref[...]   # [TB, 2]


# -----------------------------------------------------------------------------
# Parameter init (deterministic, mimics nn.Linear default U(-1/sqrt(fan_in), ..))
# -----------------------------------------------------------------------------
def _init_critic_params(seed: int, in_dim: int, hidden: int):
    key = jax.random.PRNGKey(seed)
    dims = [(in_dim, hidden), (hidden, hidden), (hidden, 1)]
    params = []
    for fan_in, fan_out in dims:
        key, kw, kb = jax.random.split(key, 3)
        bound = 1.0 / jnp.sqrt(float(fan_in))
        w = jax.random.uniform(kw, (fan_in, fan_out), jnp.float32, -bound, bound)
        b = jax.random.uniform(kb, (1, fan_out), jnp.float32, -bound, bound)
        params += [w, b]
    return tuple(params)  # (w1, b1, w2, b2, w3, b3)


def _fuse_params(params_a, params_b, in_dim: int, in_pad: int, hidden: int):
    """Pack two independent critics into one block-diagonal weight set."""
    w1a, b1a, w2a, b2a, w3a, b3a = params_a
    w1b, b1b, w2b, b2b, w3b, b3b = params_b
    h2x = 2 * hidden

    # Layer 1: side-by-side ([in_dim, H] | [in_dim, H]) -> [in_dim, 2H],
    # zero-padded rows so K == in_pad matches the padded input slab.
    w1 = jnp.concatenate([w1a, w1b], axis=1)
    w1 = jnp.pad(w1, ((0, in_pad - in_dim), (0, 0)))             # [in_pad, 2H]
    b1 = jnp.concatenate([b1a, b1b], axis=1)                     # [1, 2H]

    # Layer 2: block diagonal so the two streams stay independent.
    w2 = jnp.zeros((h2x, h2x), jnp.float32)
    w2 = w2.at[:hidden, :hidden].set(w2a).at[hidden:, hidden:].set(w2b)
    b2 = jnp.concatenate([b2a, b2b], axis=1)                     # [1, 2H]

    # Layer 3: per-lane weight vector (consumed by VPU mult + XLU half-sums).
    w3v = jnp.concatenate([w3a[:, 0], w3b[:, 0]], axis=0).reshape(1, h2x)
    b3 = jnp.concatenate([b3a, b3b], axis=1)                     # [1, 2]

    # bf16 MXU operands; biases and the VPU vector stay f32.
    return (w1.astype(jnp.bfloat16), b1,
            w2.astype(jnp.bfloat16), b2,
            w3v.astype(jnp.float32), b3)


# -----------------------------------------------------------------------------
# Wrapper.
# -----------------------------------------------------------------------------
class MATD3CriticPallas:
    def __init__(self, state_dim: int, action_dim: int, n_other: int,
                 hidden: int = 64, seed: int = 123):
        self.S = state_dim
        self.A = action_dim
        self.NS = n_other * state_dim
        self.NA = n_other * action_dim
        self.H = hidden
        self.in_dim = self.S + self.NS + self.NA + self.A
        self.in_pad = _round_up(self.in_dim, 64)   # padded K for one MXU matmul
        # Per-critic f32 params kept for reference checking / parity.
        self.params_a = _init_critic_params(seed, self.in_dim, hidden)
        self.params_b = _init_critic_params(seed + 1, self.in_dim, hidden)
        # Fused (block-diagonal) bf16/f32 weights consumed by the kernel.
        self.fused = _fuse_params(self.params_a, self.params_b,
                                  self.in_dim, self.in_pad, hidden)

    @staticmethod
    def _pick_tile_b(batch: int) -> int:
        if batch <= 8:
            return batch  # single tiny full-extent block
        # Aim for >= 2 grid steps so the "parallel" axis shards across both
        # TensorCores on v7x; cap the tile at _MAX_TILE_B rows.
        return min(_MAX_TILE_B, _round_up(-(-batch // 2), 8))

    @functools.partial(jax.jit, static_argnums=0)
    def forward(self, state, other_agent_states, other_agent_actions, action):
        B = state.shape[0]
        # Wrapper-side concat + bf16 cast + zero-pad of the feature dim: one
        # lane-dense [B, in_pad] bf16 stream instead of 4 narrow f32 streams.
        x = jnp.concatenate(
            [state.reshape(B, self.S).astype(jnp.float32),
             other_agent_states.reshape(B, self.NS).astype(jnp.float32),
             other_agent_actions.reshape(B, self.NA).astype(jnp.float32),
             action.reshape(B, self.A).astype(jnp.float32)],
            axis=-1).astype(jnp.bfloat16)
        if self.in_pad > self.in_dim:
            x = jnp.pad(x, ((0, 0), (0, self.in_pad - self.in_dim)))

        TB = self._pick_tile_b(B)
        grid = (pl.cdiv(B, TB),)
        H2 = 2 * self.H

        def resident(arr):
            # Constant index_map: fetched once, stays resident across the grid.
            return pl.BlockSpec(arr.shape, lambda i: (0, 0))

        w_bytes = sum(int(w.size) * w.dtype.itemsize for w in self.fused)
        cost = pl.CostEstimate(
            flops=2 * B * (self.in_pad * H2 + H2 * H2 + H2),
            transcendentals=0,
            bytes_accessed=B * (self.in_pad * 2 + 2 * 4) + w_bytes)

        q = pl.pallas_call(
            _matd3_fused_kernel,
            out_shape=jax.ShapeDtypeStruct((B, 2), jnp.float32),
            grid=grid,
            in_specs=[pl.BlockSpec((TB, self.in_pad), lambda i: (i, 0))]
                     + [resident(w) for w in self.fused],
            out_specs=pl.BlockSpec((TB, 2), lambda i: (i, 0)),
            compiler_params=pltpu.CompilerParams(
                dimension_semantics=("parallel",)),
            cost_estimate=cost,
        )(x, *self.fused)

        return q[:, 0:1], q[:, 1:2]

    def qa(self, state, other_agent_states, other_agent_actions, action):
        """Forward pass through only one stream (stream A)."""
        q1, _ = self.forward(state, other_agent_states, other_agent_actions, action)
        return q1


# -----------------------------------------------------------------------------
# Pure-JAX f32 reference for sanity checking.
# -----------------------------------------------------------------------------
def _ref_mlp(x, params):
    w1, b1, w2, b2, w3, b3 = params
    h1 = jnp.maximum(x @ w1 + b1, 0.0)
    h2 = jnp.maximum(h1 @ w2 + b2, 0.0)
    return h2 @ w3 + b3


if __name__ == "__main__":
    # Small deterministic example shapes.
    B, S, A, N_OTHER, HIDDEN = 2, 16, 4, 2, 64
    key = jax.random.PRNGKey(0)
    k1, k2, k3, k4 = jax.random.split(key, 4)
    state = jax.random.normal(k1, (B, S), jnp.float32)
    other_agent_states = jax.random.normal(k2, (B, N_OTHER, S), jnp.float32)
    other_agent_actions = jax.random.normal(k3, (B, N_OTHER, A), jnp.float32)
    action = jax.random.normal(k4, (B, A), jnp.float32)

    critic = MATD3CriticPallas(S, A, N_OTHER, hidden=HIDDEN, seed=123)

    q1, q2 = critic.forward(state, other_agent_states, other_agent_actions, action)
    jax.block_until_ready((q1, q2))

    # Reference check against the unfused, per-critic f32 MLPs.  Tolerances are
    # loosened vs. the pure-f32 kernel because the MXU operands are now bf16
    # (accumulation stays f32, so the error is well-behaved).
    x = jnp.concatenate(
        [state.reshape(B, -1), other_agent_states.reshape(B, -1),
         other_agent_actions.reshape(B, -1), action.reshape(B, -1)], axis=-1)
    q1_ref = _ref_mlp(x, critic.params_a)
    q2_ref = _ref_mlp(x, critic.params_b)
    assert q1.shape == (B, 1) and q2.shape == (B, 1)
    assert jnp.allclose(q1, q1_ref, atol=3e-2, rtol=3e-2)
    assert jnp.allclose(q2, q2_ref, atol=3e-2, rtol=3e-2)

    # qa() = stream A only.
    qa = critic.qa(state, other_agent_states, other_agent_actions, action)
    jax.block_until_ready(qa)
    assert jnp.allclose(qa, q1_ref, atol=3e-2, rtol=3e-2)

    # Second small batch that exercises a multi-step grid and a masked partial
    # last block (B=24 -> TB=16, grid=(2,)).
    B2 = 24
    k5, k6, k7, k8 = jax.random.split(jax.random.PRNGKey(1), 4)
    st2 = jax.random.normal(k5, (B2, S), jnp.float32)
    os2 = jax.random.normal(k6, (B2, N_OTHER, S), jnp.float32)
    oa2 = jax.random.normal(k7, (B2, N_OTHER, A), jnp.float32)
    ac2 = jax.random.normal(k8, (B2, A), jnp.float32)
    q1b, q2b = critic.forward(st2, os2, oa2, ac2)
    jax.block_until_ready((q1b, q2b))
    x2 = jnp.concatenate([st2.reshape(B2, -1), os2.reshape(B2, -1),
                          oa2.reshape(B2, -1), ac2.reshape(B2, -1)], axis=-1)
    assert jnp.allclose(q1b, _ref_mlp(x2, critic.params_a), atol=3e-2, rtol=3e-2)
    assert jnp.allclose(q2b, _ref_mlp(x2, critic.params_b), atol=3e-2, rtol=3e-2)

    print("KERNEL_OK")
</pallas_src>

<mosaic_0001>
module attributes {stable_mosaic.version = 11 : i64} {
  func.func @_matd3_fused_kernel(%arg0: i32, %arg1: memref<2x64xbf16, #tpu.memory_space<vmem>>, %arg2: memref<64x128xbf16, #tpu.memory_space<vmem>>, %arg3: memref<1x128xf32, #tpu.memory_space<vmem>>, %arg4: memref<128x128xbf16, #tpu.memory_space<vmem>>, %arg5: memref<1x128xf32, #tpu.memory_space<vmem>>, %arg6: memref<1x128xf32, #tpu.memory_space<vmem>>, %arg7: memref<1x2xf32, #tpu.memory_space<vmem>>, %arg8: memref<2x2xf32, #tpu.memory_space<vmem>>) attributes {dimension_semantics = [#tpu.dimension_semantics<parallel>], iteration_bounds = array<i64: 1>, scalar_prefetch = 0 : i64, scratch_operands = 0 : i64, tpu.core_type = #tpu.core_type<tc>, window_params = [{transform_indices = @transform_0, window_bounds = array<i64: 2, 64>}, {pipeline_mode = #tpu.pipeline_mode<synchronous>, transform_indices = @transform_1, window_bounds = array<i64: 64, 128>}, {pipeline_mode = #tpu.pipeline_mode<synchronous>, transform_indices = @transform_2, window_bounds = array<i64: 1, 128>}, {pipeline_mode = #tpu.pipeline_mode<synchronous>, transform_indices = @transform_3, window_bounds = array<i64: 128, 128>}, {pipeline_mode = #tpu.pipeline_mode<synchronous>, transform_indices = @transform_4, window_bounds = array<i64: 1, 128>}, {pipeline_mode = #tpu.pipeline_mode<synchronous>, transform_indices = @transform_5, window_bounds = array<i64: 1, 128>}, {pipeline_mode = #tpu.pipeline_mode<synchronous>, transform_indices = @transform_6, window_bounds = array<i64: 1, 2>}, {transform_indices = @transform_7, window_bounds = array<i64: 2, 2>}]} {
    %c0 = arith.constant 0 : index
    %c0_0 = arith.constant 0 : index
    %0 = vector.load %arg1[%c0, %c0_0] : memref<2x64xbf16, #tpu.memory_space<vmem>>, vector<2x64xbf16>
    %c0_1 = arith.constant 0 : index
    %c0_2 = arith.constant 0 : index
    %1 = vector.load %arg2[%c0_1, %c0_2] : memref<64x128xbf16, #tpu.memory_space<vmem>>, vector<64x128xbf16>
    %cst = arith.constant dense<0.000000e+00> : vector<2x128xf32>
    %2 = tpu.matmul %0, %1, %cst {dimension_numbers = #tpu.dot_dimension_numbers<[1], [0], [0], [1], [0, 0, 1, 1], [], []>} : vector<2x64xbf16>, vector<64x128xbf16>, vector<2x128xf32> -> vector<2x128xf32>
    %c0_3 = arith.constant 0 : index
    %c0_4 = arith.constant 0 : index
    %3 = vector.load %arg3[%c0_3, %c0_4] : memref<1x128xf32, #tpu.memory_space<vmem>>, vector<1x128xf32>
    %4 = vector.broadcast %3 : vector<1x128xf32> to vector<2x128xf32>
    %5 = arith.addf %2, %4 : vector<2x128xf32>
    %cst_5 = arith.constant 0.000000e+00 : f32
    %6 = vector.broadcast %cst_5 : f32 to vector<2x128xf32>
    %7 = arith.maximumf %5, %6 : vector<2x128xf32>
    %8 = arith.truncf %7 : vector<2x128xf32> to vector<2x128xbf16>
    %c0_6 = arith.constant 0 : index
    %c0_7 = arith.constant 0 : index
    %9 = vector.load %arg4[%c0_6, %c0_7] : memref<128x128xbf16, #tpu.memory_space<vmem>>, vector<128x128xbf16>
    %cst_8 = arith.constant dense<0.000000e+00> : vector<2x128xf32>
    %10 = tpu.matmul %8, %9, %cst_8 {dimension_numbers = #tpu.dot_dimension_numbers<[1], [0], [0], [1], [0, 0, 1, 1], [], []>} : vector<2x128xbf16>, vector<128x128xbf16>, vector<2x128xf32> -> vector<2x128xf32>
    %c0_9 = arith.constant 0 : index
    %c0_10 = arith.constant 0 : index
    %11 = vector.load %arg5[%c0_9, %c0_10] : memref<1x128xf32, #tpu.memory_space<vmem>>, vector<1x128xf32>
    %12 = vector.broadcast %11 : vector<1x128xf32> to vector<2x128xf32>
    %13 = arith.addf %10, %12 : vector<2x128xf32>
    %cst_11 = arith.constant 0.000000e+00 : f32
    %14 = vector.broadcast %cst_11 : f32 to vector<2x128xf32>
    %15 = arith.maximumf %13, %14 : vector<2x128xf32>
    %c0_12 = arith.constant 0 : index
    %c0_13 = arith.constant 0 : index
    %16 = vector.load %arg6[%c0_12, %c0_13] : memref<1x128xf32, #tpu.memory_space<vmem>>, vector<1x128xf32>
    %17 = vector.broadcast %16 : vector<1x128xf32> to vector<2x128xf32>
    %18 = arith.mulf %15, %17 : vector<2x128xf32>
    %19 = tpu.iota {dimensions = array<i32: 1>} : vector<2x128xi32>
    %c64_i32 = arith.constant 64 : i32
    %20 = vector.broadcast %c64_i32 : i32 to vector<2x128xi32>
    %21 = arith.cmpi slt, %19, %20 : vector<2x128xi32>
    %cst_14 = arith.constant 0.000000e+00 : f32
    %22 = vector.broadcast %cst_14 : f32 to vector<2x128xf32>
    %23 = arith.select %21, %18, %22 : vector<2x128xi1>, vector<2x128xf32>
    %cst_15 = arith.constant dense<0.000000e+00> : vector<2xf32>
    %24 = vector.multi_reduction <add>, %23, %cst_15 [1] : vector<2x128xf32> to vector<2xf32>
    %25 = vector.shape_cast %24 : vector<2xf32> to vector<2x1xf32>
    %c64_i32_16 = arith.constant 64 : i32
    %26 = vector.broadcast %c64_i32_16 : i32 to vector<2x128xi32>
    %27 = arith.cmpi sge, %19, %26 : vector<2x128xi32>
    %cst_17 = arith.constant 0.000000e+00 : f32
    %28 = vector.broadcast %cst_17 : f32 to vector<2x128xf32>
    %29 = arith.select %27, %18, %28 : vector<2x128xi1>, vector<2x128xf32>
    %cst_18 = arith.constant dense<0.000000e+00> : vector<2xf32>
    %30 = vector.multi_reduction <add>, %29, %cst_18 [1] : vector<2x128xf32> to vector<2xf32>
    %31 = vector.shape_cast %30 : vector<2xf32> to vector<2x1xf32>
    %32 = tpu.concatenate %25, %31 in 1 : vector<2x1xf32>, vector<2x1xf32> -> vector<2x2xf32>
    %c0_19 = arith.constant 0 : index
    %c0_20 = arith.constant 0 : index
    %33 = vector.load %arg7[%c0_19, %c0_20] : memref<1x2xf32, #tpu.memory_space<vmem>>, vector<1x2xf32>
    %34 = vector.broadcast %33 : vector<1x2xf32> to vector<2x2xf32>
    %35 = arith.addf %32, %34 : vector<2x2xf32>
    %c0_21 = arith.constant 0 : index
    %c0_22 = arith.constant 0 : index
    %36 = vector.load %arg8[%c0_21, %c0_22] : memref<2x2xf32, #tpu.memory_space<vmem>>, vector<2x2xf32>
    tpu.vector_store %arg8[%c0_21, %c0_22], %35 {strides = array<i32>} : memref<2x2xf32, #tpu.memory_space<vmem>>, vector<2x2xf32>,
    return
  }
  func.func @transform_0(%arg0: i32) -> (i32, i32) {
    %c0_i32 = arith.constant 0 : i32
    %c0_i32_0 = arith.constant 0 : i32
    return %arg0, %c0_i32 : i32, i32
  }
  func.func @transform_1(%arg0: i32) -> (i32, i32) {
    %c0_i32 = arith.constant 0 : i32
    %c0_i32_0 = arith.constant 0 : i32
    %c0_i32_1 = arith.constant 0 : i32
    return %c0_i32, %c0_i32_0 : i32, i32
  }
  func.func @transform_2(%arg0: i32) -> (i32, i32) {
    %c0_i32 = arith.constant 0 : i32
    %c0_i32_0 = arith.constant 0 : i32
    %c0_i32_1 = arith.constant 0 : i32
    return %c0_i32, %c0_i32_0 : i32, i32
  }
  func.func @transform_3(%arg0: i32) -> (i32, i32) {
    %c0_i32 = arith.constant 0 : i32
    %c0_i32_0 = arith.constant 0 : i32
    %c0_i32_1 = arith.constant 0 : i32
    return %c0_i32, %c0_i32_0 : i32, i32
  }
  func.func @transform_4(%arg0: i32) -> (i32, i32) {
    %c0_i32 = arith.constant 0 : i32
    %c0_i32_0 = arith.constant 0 : i32
    %c0_i32_1 = arith.constant 0 : i32
    return %c0_i32, %c0_i32_0 : i32, i32
  }
  func.func @transform_5(%arg0: i32) -> (i32, i32) {
    %c0_i32 = arith.constant 0 : i32
    %c0_i32_0 = arith.constant 0 : i32
    %c0_i32_1 = arith.constant 0 : i32
    return %c0_i32, %c0_i32_0 : i32, i32
  }
  func.func @transform_6(%arg0: i32) -> (i32, i32) {
    %c0_i32 = arith.constant 0 : i32
    %c0_i32_0 = arith.constant 0 : i32
    %c0_i32_1 = arith.constant 0 : i32
    return %c0_i32, %c0_i32_0 : i32, i32
  }
  func.func @transform_7(%arg0: i32) -> (i32, i32) {
    %c0_i32 = arith.constant 0 : i32
    %c0_i32_0 = arith.constant 0 : i32
    return %arg0, %c0_i32 : i32, i32
  }
}

</mosaic_0001>

<bundles_post_ra>
// kernel: forward.1
= control target key start
LH: loop header
LB: loop body
LE: loop exit
PB: predicated region body
PF: predicated region fallthrough
CT: control target
= control target key end

     0   :  { %12 = vsyncpa [#allocation3], 0  ;;  %s381_s24 = smov [#allocation2]   ;;  %s480_s0 = inlined_call_operand.vmem [shape: bf16[2,64], index: 0, kind: input, shape index: {}]   ;;  %s481_s1 = inlined_call_operand.hbm [shape: bf16[64,128], index: 1, kind: input, shape index: {}]   ;;  %s482_s2 = inlined_call_operand.vmem [shape: f32[1,128], index: 2, kind: input, shape index: {}]   ;;  %s483_s3 = inlined_call_operand.vmem [shape: bf16[128,128], index: 3, kind: input, shape index: {}]   ;;  %s484_s4 = inlined_call_operand.vmem [shape: f32[1,128], index: 4, kind: input, shape index: {}]   ;;  %s485_s5 = inlined_call_operand.vmem [shape: f32[1,128], index: 5, kind: input, shape index: {}]   ;;  %s486_s6 = inlined_call_operand.vmem [shape: f32[1,2], index: 6, kind: input, shape index: {}]   ;;  %s487_s7 = inlined_call_operand.vmem [shape: f32[2,2], index: 7, kind: output, shape index: {}]  }
   0x1   :  { %s20_s25 = sshll.u32 %s381_s24, 4  ;;  %s357_s28 = scalar_lea.hbm %s481_s1, 512  ;;  %s21_s25 = int_to_ptr.vmem [resolvable:$true] %s20_s25 }
   0x2   :  { %p358_p0 = scmp.ne.s32.totalorder %s481_s1, %s357_s28  ;;  %p361_p1 = scmp.lt.u32.totalorder %s357_s28, %s481_s1 }
   0x4   :  { %p363_p2 = pnand %p361_p1, %p358_p0 }
   0x6   :  { %366 = shalt.err (!%p363_p2)
}
   0x7   :  { %s367_s10 = scalar_lea.vmem %s21_s25, 512  ;;  %p372_p4 = scmp.lt.s32.totalorder %s21_s25, %s21_s25 }
   0x8   :  { %p368_p3 = scmp.ne.s32.totalorder %s21_s25, %s367_s10  ;;  %p373_p5 = scmp.lt.s32.totalorder %s367_s10, %s367_s10 }
   0xa   :  { %p374_p6 = por %p373_p5, %p372_p4 }
   0xc   :  { %p375_p7 = pnand %p374_p6, %p368_p3 }
   0xe   :  { %378 = shalt.err (!%p375_p7)
}
   0xf   :  { %s382_s11 = smov 64   ;;  %s383_s12 = smov 4  }
  0x10   :  { %26 = dma.hbm_to_vmem [thread:$0]  %s481_s1, 512, %s21_s25, [#allocation3], %s382_s11, %s382_s11, %s383_s12  }
  0x11   :  { %379 = dma.done.wait [#allocation3], 512  }
  0x12   :  { %380 = vsyncadd [#allocation3], 4294966784  ;;  %v384_v0 = vmov 0.0   ;;  %vm385_vm0 = vmmov 0   ;;  %v345_v1 = vld [vmem:[#allocation2] sm:$0xff]   ;;  %v346_v2 = vld [vmem:[#allocation2 + $0x8] sm:$0xff]   ;;  %v247_v22 = vlaneseq }
  0x13   :  { %308 = vmatprep.subr.bf16.mxu0 %v384_v0  ;;  %316 = vmatprep.mubr.msk.bf16.mxu0 %vm385_vm0, %v384_v0  ;;  %v349_v3 = vld [vmem:[%s483_s3] sm:$0xff]   ;;  %v347_v4 = vld [vmem:[#allocation2 + $0x10] sm:$0xff]   ;;  %v350_v5 = vld [vmem:[%s483_s3 + $0x8] sm:$0xff]   ;;  %vm81_vm1 = vcmask 523264   ;;  %vm251_vm3 = vcmask 1041408   ;;  %vm260_vm5 = vcmask 7168  }
  0x14   :  { %320 = vmatprep.subr.bf16.mxu1 %v384_v0  ;;  %336 = vmatprep.mubr.msk.bf16.mxu1 %vm385_vm0, %v384_v0  ;;  %v348_v6 = vld [vmem:[#allocation2 + $0x18] sm:$0xff]   ;;  %v351_v7 = vld [vmem:[%s483_s3 + $0x10] sm:$0xff]   ;;  %v41_v8 = vld [vmem:[%s480_s0] sm:$0x1]  ;;  %v248_v25 = vand.u32 127, %v247_v22  ;;  %vm270_vm6 = vcmask 9216  }
  0x15   :  { %309 = vmatpush3.bf16.msra.mxu0 %v345_v1  ;;  %321 = vmatpush3.bf16.msra.mxu1 %v349_v3  ;;  %v352_v9 = vld [vmem:[%s483_s3 + $0x18] sm:$0xff]   ;;  %v353_v10 = vld [vmem:[%s483_s3 + $0x20] sm:$0xff]   ;;  %v354_v11 = vld [vmem:[%s483_s3 + $0x28] sm:$0xff]  }
  0x16   :  { %310 = vmatprep.subr.bf16.mxu0 %v384_v0  ;;  %322 = vmatprep.subr.bf16.mxu1 %v384_v0  ;;  %v355_v12 = vld [vmem:[%s483_s3 + $0x30] sm:$0xff]   ;;  %v356_v13 = vld [vmem:[%s483_s3 + $0x38] sm:$0xff]   ;;  %v277_v14 = vld [vmem:[%s482_s2] ss:$0 sm:$0xff]  ;;  %vm249_vm2 = vcmp.lt.s32.totalorder %v248_v25, 64  ;;  %vm255_vm4 = vcmp.ge.s32.totalorder %v248_v25, 64 }
  0x17   :  { %v283_v23 = vld [vmem:[%s484_s4] ss:$0 sm:$0xff] }
  0x18   :  { %v292_v29 = vld [vmem:[%s485_s5] ss:$0 sm:$0xff] }
  0x19   :  { %311 = vmatpush3.bf16.msra.mxu0 %v346_v2  ;;  %323 = vmatpush3.bf16.msra.mxu1 %v350_v5  ;;  %v293_v38 = vld [vmem:[%s486_s6] ss:$0 sm:$0xff] }
  0x1a   :  { %312 = vmatprep.subr.bf16.mxu0 %v384_v0  ;;  %324 = vmatprep.subr.bf16.mxu1 %v384_v0 }
  0x1d   :  { %313 = vmatpush3.bf16.msra.mxu0 %v347_v4  ;;  %325 = vmatpush3.bf16.msra.mxu1 %v351_v7 }
  0x1e   :  { %314 = vmatprep.subr.bf16.mxu0 %v384_v0  ;;  %326 = vmatprep.subr.bf16.mxu1 %v384_v0 }
  0x21   :  { %315 = vmatpush3.bf16.msra.mxu0 %v348_v6  ;;  %327 = vmatpush3.bf16.msra.mxu1 %v352_v9 }
  0x22   :  { %328 = vmatprep.subr.bf16.mxu1 %v384_v0 }
  0x24   :  { %317 = vmatmul.mubr.msk.bf16.vlgmr.msra.gmra.mrb[0].mxu0 %vm81_vm1, %v41_v8 }
  0x25   :  { %329 = vmatpush3.bf16.msra.mxu1 %v353_v10 }
  0x26   :  { %330 = vmatprep.subr.bf16.mxu1 %v384_v0 }
  0x29   :  { %331 = vmatpush3.bf16.msra.mxu1 %v354_v11 }
  0x2a   :  { %332 = vmatprep.subr.bf16.mxu1 %v384_v0 }
  0x2d   :  { %333 = vmatpush3.bf16.msra.mxu1 %v355_v12 }
  0x2e   :  { %334 = vmatprep.subr.bf16.mxu1 %v384_v0 }
  0x31   :  { %335 = vmatpush3.bf16.msra.mxu1 %v356_v13 }
  0xf7   :  { %v119_v15 = vpop.f32.mrb[0].mxu0 }
  0xf8   :  { %v120_v16 = vadd.f32 %v277_v14, %v119_v15  ;;  %v318_v17 = vpop.f32.mrb[1].mxu0 }
  0xf9   :  { %v122_v18 = vpop.f32.mrb[2].mxu0 }
  0xfa   :  { %v125_v19 = vmax.f32 %v120_v16, 0.0  ;;  %v319_v20 = vpop.f32.mrb[3].mxu0 }
  0xfc   :  { %v126_v21 = vpack.c.bf16 %v125_v19, %v125_v19 }
  0xfe   :  { %337 = vmatmul.mubr.bf16.vlgmr.msra.gmra.mrb[0].mxu1 %v126_v21 }
 0x1d1   :  { %v232_v24 = vpop.f32.mrb[0].mxu1 }
 0x1d2   :  { %v233_v26 = vadd.f32 %v283_v23, %v232_v24  ;;  %v338_v27 = vpop.f32.mrb[1].mxu1 }
 0x1d3   :  { %v235_v28 = vpop.f32.mrb[2].mxu1 }
 0x1d4   :  { %v238_v30 = vmax.f32 %v233_v26, 0.0  ;;  %v339_v31 = vpop.f32.mrb[3].mxu1 }
 0x1d6   :  { %v246_v32 = vmul.f32 %v292_v29, %v238_v30 }
 0x1d8   :  { %v250_v33 = vsel %vm249_vm2, %v246_v32, 0.0  ;;  %v256_v35 = vsel %vm255_vm4, %v246_v32, 0.0 }
 0x1d9   :  { %v252_v34 = vsel %vm251_vm3, %v250_v33, 0.0  ;;  %v257_v36 = vsel %vm251_vm3, %v256_v35, 0.0 }
 0x1da   :  { %253 = vadd.xlane.f32.xlu0 %v252_v34 }
 0x1de   :  { %258 = vadd.xlane.f32.xlu0 %v257_v36 }
 0x267   :  { %v254_v37 = vpop.xlane.xlu0 %253 }
 0x26b   :  { %v259_v39 = vpop.xlane.xlu0 %258 }
 0x26c   :  { %v261_v40 = vsel %vm260_vm5, %v254_v37, %v259_v39 }
 0x26d   :  { %v269_v41 = vadd.f32 %v293_v38, %v261_v40 }
 0x26f   :  { %271 = vst.msk [vmem:[%s487_s7] sm:$0x3] %vm270_vm6, %v269_v41 }
 0x270   :  { %276 = vsyncpa [#allocation3], 1 }

</bundles_post_ra>
